<compile_context>
chip_gen: v5e
topology: v5e:2x2
jax: 0.10.0
libtpu: 0.0.40
codegen_flags: <defaults>
</compile_context>

<pallas_src>
import functools

import jax
import jax.numpy as jnp
from jax.experimental import pallas as pl
from jax.experimental.pallas import tpu as pltpu


def _inverse_rotate_kernel(x_ref, wt_ref, o_ref):
    # o = x @ W^T ; wt_ref already holds (a column tile of) W^T.
    o_ref[...] = jnp.dot(
        x_ref[...], wt_ref[...], preferred_element_type=jnp.float32
    ).astype(o_ref.dtype)


@functools.lru_cache(maxsize=None)
def _vmem_budget_bytes() -> int:
    """Generation-aware scoped-VMEM budget (leaves headroom for Mosaic scratch)."""
    try:
        cap = int(pltpu.get_tpu_info().vmem_capacity_bytes)
    except Exception:  # conservative fallback: v7x per-TC capacity (smallest)
        cap = 64 << 20
    # ~85% of physical: ~108 MiB on v5e/v6e (128 MiB), ~54 MiB on v7x (64 MiB).
    return int(cap * 0.85)


@functools.lru_cache(maxsize=None)
def _weight_buffer_count() -> int:
    """Return 1 if pipeline_mode=pl.Buffered(1) is supported, else 2 (default)."""
    try:
        def probe(a_ref, o_ref):
            o_ref[...] = a_ref[...] + 1.0

        x = jnp.zeros((8, 128), jnp.float32)
        out = pl.pallas_call(
            probe,
            out_shape=jax.ShapeDtypeStruct((16, 128), jnp.float32),
            grid=(2,),
            in_specs=[pl.BlockSpec((8, 128), lambda i: (0, 0),
                                   pipeline_mode=pl.Buffered(1))],
            out_specs=pl.BlockSpec((8, 128), lambda i: (i, 0)),
        )(x)
        jax.block_until_ready(out)
        return 1
    except Exception:
        return 2


def _choose_plan(rows, n_pad, itemsize, weight_buffers, budget, tm_req):
    """Pick (mode, tm, tn): mode is 'resident' (W^T fully in VMEM) or 'tiled'."""
    # ---- row tile ----
    tm = tm_req
    if rows >= 4 * tm_req:
        # Big row counts: larger tiles amortize the ~0.35us/step grid overhead
        # (matters most on v5e's low HBM bandwidth).
        tm = max(tm, 1024)
    tm = min(tm, 8 * pl.cdiv(rows, 8))      # never (much) exceed the row count
    tm = max(8, (tm // 8) * 8)              # sublane multiple
    # Guarantee >= 2 grid steps so megacore sharding (v7x: 2 TCs) can split
    # the work even when all rows would fit in a single tile.
    if rows > 8 and pl.cdiv(rows, tm) < 2:
        tm = max(8, 8 * pl.cdiv(pl.cdiv(rows, 2), 8))

    # ---- resident-weight path: W^T lives in VMEM for the whole grid ----
    def resident_need(tm_):
        return (weight_buffers * n_pad * n_pad    # W^T (1 or 2 buffers)
                + 2 * tm_ * n_pad                 # x tile, double-buffered
                + 2 * tm_ * n_pad) * itemsize     # out tile, double-buffered

    tm_res = tm
    while tm_res > 128 and resident_need(tm_res) > budget:
        tm_res = max(128, ((tm_res // 2) // 8) * 8)
    if resident_need(tm_res) <= budget:
        return "resident", tm_res, n_pad

    # ---- N-tiled fallback (large n; mainly v7x's 64 MiB VMEM) ----
    # W^T block changes along j here, so it keeps the default double buffer.
    def tiled_need(tm_, tn_):
        return 2 * (tm_ * n_pad + n_pad * tn_ + tm_ * tn_) * itemsize

    tm_t = min(tm, 256)
    tn = 256
    for cand in (2048, 1024, 512, 256):
        if cand <= n_pad and tiled_need(tm_t, cand) <= budget:
            tn = cand
            break
    # TODO(synk): add a K-tiled accumulator path for n so large that even a
    # (tm, n) row tile of x overflows the VMEM budget.
    return "tiled", tm_t, tn


@functools.partial(jax.jit, static_argnums=(2, 3, 4, 5, 6))
def _inverse_rotate_impl(x, weight, tm_req, compute_dtype, weight_is_transposed,
                         weight_buffers, vmem_budget):
    *lead, n = x.shape
    rows = 1
    for d in lead:
        rows *= d
    x2d = x.reshape(rows, n)

    # Transpose hoisted out of the kernel (or skipped entirely if the caller
    # already passes W^T).
    wt = weight if weight_is_transposed else weight.T

    if compute_dtype is not None:
        x2d = x2d.astype(compute_dtype)
        wt = wt.astype(compute_dtype)

    # Lane-dense hidden dim (multiple of 128).  Zero rows/cols contribute
    # nothing to the matmul and are sliced off below.  Rows are NOT padded.
    n_pad = 128 * pl.cdiv(n, 128)
    if n_pad != n:
        x2d = jnp.pad(x2d, ((0, 0), (0, n_pad - n)))
        wt = jnp.pad(wt, ((0, n_pad - n), (0, n_pad - n)))

    itemsize = jnp.dtype(x2d.dtype).itemsize
    mode, tm, tn = _choose_plan(rows, n_pad, itemsize, weight_buffers,
                                vmem_budget, tm_req)

    if mode == "resident":
        grid = (pl.cdiv(rows, tm),)
        if weight_buffers == 1:
            # Constant block index -> fetched once; single buffer saves n^2
            # of VMEM versus the default 2-deep pipeline.
            wt_spec = pl.BlockSpec((n_pad, n_pad), lambda i: (0, 0),
                                   pipeline_mode=pl.Buffered(1))
        else:
            wt_spec = pl.BlockSpec((n_pad, n_pad), lambda i: (0, 0))
        in_specs = [pl.BlockSpec((tm, n_pad), lambda i: (i, 0)), wt_spec]
        out_specs = pl.BlockSpec((tm, n_pad), lambda i: (i, 0))
        semantics = ("parallel",)
        need = (weight_buffers * n_pad * n_pad + 4 * tm * n_pad) * itemsize
    else:
        grid = (pl.cdiv(rows, tm), pl.cdiv(n_pad, tn))
        in_specs = [pl.BlockSpec((tm, n_pad), lambda i, j: (i, 0)),
                    pl.BlockSpec((n_pad, tn), lambda i, j: (0, j))]
        out_specs = pl.BlockSpec((tm, tn), lambda i, j: (i, j))
        semantics = ("parallel", "arbitrary")
        need = 2 * (tm * n_pad + n_pad * tn + tm * tn) * itemsize

    vmem_limit = int(min(vmem_budget, max(int(1.25 * need), 32 << 20)))
    out_itemsize = jnp.dtype(x.dtype).itemsize

    out2d = pl.pallas_call(
        _inverse_rotate_kernel,
        out_shape=jax.ShapeDtypeStruct((rows, n_pad), x.dtype),
        grid=grid,
        in_specs=in_specs,
        out_specs=out_specs,
        compiler_params=pltpu.CompilerParams(
            dimension_semantics=semantics,
            vmem_limit_bytes=vmem_limit,
        ),
        cost_estimate=pl.CostEstimate(
            flops=2 * rows * n_pad * n_pad,
            transcendentals=0,
            bytes_accessed=(rows * n_pad * (itemsize + out_itemsize)
                            + n_pad * n_pad * itemsize),
        ),
    )(x2d, wt)

    if n_pad != n:
        out2d = out2d[:, :n]
    return out2d.reshape(*lead, n)


def inverse_rotate(x, weight, *, tm=512, compute_dtype=None,
                   weight_is_transposed=False):
    """y = x @ weight.T  — matches InverseRotateLayer.forward.

    compute_dtype=jnp.bfloat16 enables the fast MXU path (off by default to
    preserve the orthogonal rotation's precision).  If the layer is applied
    repeatedly, pass a pre-transposed weight with weight_is_transposed=True
    to skip the per-call transpose.
    """
    n = x.shape[-1]
    assert weight.shape == (n, n), "RotateLayer weight must be (n, n)"
    return _inverse_rotate_impl(
        x, weight, int(tm), compute_dtype, bool(weight_is_transposed),
        _weight_buffer_count(), _vmem_budget_bytes())


if __name__ == "__main__":
    key = jax.random.PRNGKey(0)
    kx, kw = jax.random.split(key)

    batch, seq, hidden = 2, 8, 32

    # Deterministic inputs.
    x = jax.random.normal(kx, (batch, seq, hidden), dtype=jnp.float32)

    # RotateLayer weight is an (n, n) orthogonal matrix; build one
    # deterministically via QR of a random normal matrix.
    a = jax.random.normal(kw, (hidden, hidden), dtype=jnp.float32)
    weight, _ = jnp.linalg.qr(a)

    y = inverse_rotate(x, weight)
    y = jax.block_until_ready(y)

    # Correctness check against plain-JAX reference of the PyTorch forward.
    y_ref = jnp.matmul(x, weight.T)
    assert y.shape == (batch, seq, hidden)
    assert jnp.allclose(y, y_ref, atol=1e-5, rtol=1e-5), "mismatch vs reference"

    print("KERNEL_OK")
</pallas_src>

<mosaic_0001>
module attributes {stable_mosaic.version = 11 : i64} {
  func.func @probe(%arg0: i32, %arg1: memref<8x128xf32, #tpu.memory_space<vmem>>, %arg2: memref<8x128xf32, #tpu.memory_space<vmem>>) attributes {dimension_semantics = [#tpu.dimension_semantics<arbitrary>], iteration_bounds = array<i64: 2>, scalar_prefetch = 0 : i64, scratch_operands = 0 : i64, tpu.core_type = #tpu.core_type<tc>, window_params = [{pipeline_mode = #tpu.pipeline_mode<synchronous>, transform_indices = @transform_0, window_bounds = array<i64: 8, 128>}, {transform_indices = @transform_1, window_bounds = array<i64: 8, 128>}]} {
    %c0 = arith.constant 0 : index
    %c0_0 = arith.constant 0 : index
    %0 = vector.load %arg1[%c0, %c0_0] : memref<8x128xf32, #tpu.memory_space<vmem>>, vector<8x128xf32>
    %cst = arith.constant 1.000000e+00 : f32
    %1 = vector.broadcast %cst : f32 to vector<8x128xf32>
    %2 = arith.addf %0, %1 : vector<8x128xf32>
    %c0_1 = arith.constant 0 : index
    %c0_2 = arith.constant 0 : index
    %3 = vector.load %arg2[%c0_1, %c0_2] : memref<8x128xf32, #tpu.memory_space<vmem>>, vector<8x128xf32>
    tpu.vector_store %arg2[%c0_1, %c0_2], %2 {strides = array<i32>} : memref<8x128xf32, #tpu.memory_space<vmem>>, vector<8x128xf32>,
    return
  }
  func.func @transform_0(%arg0: i32) -> (i32, i32) {
    %c0_i32 = arith.constant 0 : i32
    %c0_i32_0 = arith.constant 0 : i32
    %c0_i32_1 = arith.constant 0 : i32
    return %c0_i32, %c0_i32_0 : i32, i32
  }
  func.func @transform_1(%arg0: i32) -> (i32, i32) {
    %c0_i32 = arith.constant 0 : i32
    %c0_i32_0 = arith.constant 0 : i32
    return %arg0, %c0_i32 : i32, i32
  }
}

module attributes {stable_mosaic.version = 11 : i64} {
  func.func @_inverse_rotate_kernel(%arg0: i32, %arg1: memref<8x128xf32, #tpu.memory_space<vmem>>, %arg2: memref<128x128xf32, #tpu.memory_space<vmem>>, %arg3: memref<8x128xf32, #tpu.memory_space<vmem>>) attributes {dimension_semantics = [#tpu.dimension_semantics<parallel>], iteration_bounds = array<i64: 2>, scalar_prefetch = 0 : i64, scratch_operands = 0 : i64, tpu.core_type = #tpu.core_type<tc>, window_params = [{transform_indices = @transform_0, window_bounds = array<i64: 8, 128>}, {pipeline_mode = #tpu.pipeline_mode<synchronous>, transform_indices = @transform_1, window_bounds = array<i64: 128, 128>}, {transform_indices = @transform_2, window_bounds = array<i64: 8, 128>}]} {
    %c0 = arith.constant 0 : index
    %c0_0 = arith.constant 0 : index
    %0 = vector.load %arg1[%c0, %c0_0] : memref<8x128xf32, #tpu.memory_space<vmem>>, vector<8x128xf32>
    %c0_1 = arith.constant 0 : index
    %c0_2 = arith.constant 0 : index
    %1 = vector.load %arg2[%c0_1, %c0_2] : memref<128x128xf32, #tpu.memory_space<vmem>>, vector<128x128xf32>
    %cst = arith.constant dense<0.000000e+00> : vector<8x128xf32>
    %2 = tpu.matmul %0, %1, %cst {dimension_numbers = #tpu.dot_dimension_numbers<[1], [0], [0], [1], [0, 0, 1, 1], [], []>} : vector<8x128xf32>, vector<128x128xf32>, vector<8x128xf32> -> vector<8x128xf32>
    %c0_3 = arith.constant 0 : index
    %c0_4 = arith.constant 0 : index
    %3 = vector.load %arg3[%c0_3, %c0_4] : memref<8x128xf32, #tpu.memory_space<vmem>>, vector<8x128xf32>
    tpu.vector_store %arg3[%c0_3, %c0_4], %2 {strides = array<i32>} : memref<8x128xf32, #tpu.memory_space<vmem>>, vector<8x128xf32>,
    return
  }
  func.func @transform_0(%arg0: i32) -> (i32, i32) {
    %c0_i32 = arith.constant 0 : i32
    %c0_i32_0 = arith.constant 0 : i32
    return %arg0, %c0_i32 : i32, i32
  }
  func.func @transform_1(%arg0: i32) -> (i32, i32) {
    %c0_i32 = arith.constant 0 : i32
    %c0_i32_0 = arith.constant 0 : i32
    %c0_i32_1 = arith.constant 0 : i32
    return %c0_i32, %c0_i32_0 : i32, i32
  }
  func.func @transform_2(%arg0: i32) -> (i32, i32) {
    %c0_i32 = arith.constant 0 : i32
    %c0_i32_0 = arith.constant 0 : i32
    return %arg0, %c0_i32 : i32, i32
  }
}

</mosaic_0001>

<bundles_post_ra>
// kernel: tpu_custom_call.1
= control target key start
LH: loop header
LB: loop body
LE: loop exit
PB: predicated region body
PF: predicated region fallthrough
CT: control target
= control target key end

     0   :  { %6 = vsyncpa [#allocation3], 0  ;;  %s441_s0 = inlined_call_operand.hbm [shape: f32[8,128], index: 0, kind: input, shape index: {}]   ;;  %s442_s1 = inlined_call_operand.hbm [shape: f32[16,128], index: 1, kind: output, shape index: {}]  }
   0x1   :  { %7 = vsyncpa [#allocation4], 0 }
   0x2   :  { %9 = vsyncpa [#allocation4 + $0x1], 0  ;;  %s357_s6 = smov 0   ;;  %s359_s7 = smov 0  }
   0x3   :  { %s361_s8 = smov 0   ;;  %s363_s9 = smov 0  }
   0x4 LB: > { %s378_s10 = sadd.s32 4294967295, %s344_s9   ;;  %s188_s11 = sadd.s32 4294967294, %s344_s9   ;;  %s344_s9 = sphi %s363_s9, %s448_s9   ;;  %s340_s8 = sphi %s361_s8, %s447_s8   ;;  %s336_s7 = sphi %s359_s7, %s446_s7   ;;  %s332_s6 = sphi %s357_s6, %s445_s6  }
   0x5   : > { %s382_s12 = sadd.s32 1, %s344_s9   ;;  %s43_s13 = sadd.s32 1, %s340_s8 }
   0x6   : > { %s40_s14 = ssub.s32 %s344_s9, %s382_s12  ;;  %p53_p0 = scmp.ne.s32.totalorder %s340_s8, %s336_s7 }
   0x7   : > { %p41_p1 = scmp.eq.s32.totalorder %s40_s14, 0  ;;  %p54_p2 = scmp.eq.s32.totalorder %s378_s10, 1 }
   0x8   : > { %p59_p3 = scmp.ne.s32.totalorder %s336_s7, %s332_s6  ;;  %p60_p4 = scmp.eq.s32.totalorder %s188_s11, 1 }
   0x9   : > { %s393_s15 = scalar_select %p41_p1, %s340_s8, %s43_s13  }
   0xa   : > { %p395_p5 = por %p54_p2, %p53_p0  ;;  %p399_p6 = por %p60_p4, %p59_p3 }
   0xb   : > { %p189_p7 = scmp.ge.s32.totalorder %s344_s9, 1  ;;  %p67_p8 = scmp.lt.s32.totalorder %s344_s9, 3 }
   0xc   : > { %p212_p9 = scmp.eq.s32.totalorder %s378_s10, 0  ;;  %s79_s20 = sshll.u32 %s441_s0, 4  ;;  %s80_s20 = int_to_ptr.hbm [resolvable:$true] %s79_s20 }
   0xd   : > { %p68_p10 = pnand %p189_p7, %p67_p8  ;;  %s346_s21 = smov [#allocation2]  }
   0xe   : > { %s81_s22 = sshll.u32 %s346_s21, 4  ;;  %s82_s22 = int_to_ptr.vmem [resolvable:$true] %s81_s22 }
   0xf   : > { %p204_p11 = pneg %p68_p10  ;;  %94 = sbr.rel (%p68_p10) target bundleno = 37 (0x25), region = 24 }
  0x11   : > { %p205_p12 = pnand %p212_p9, %p204_p11 }
  0x13   : > { %207 = dma.hbm_to_vmem [thread:$0]  (!%p205_p12), %s80_s20, 128, %s82_s22, [#allocation3]  }
  0x14   : > { %323 = dma.done.wait (%p212_p9), [#allocation3], 128  }
  0x15   : > { %325 = vsyncadd (%p212_p9), [#allocation3], 4294967168  ;;  %s107_s23 = sand.u32 1, %s336_s7   ;;  %s195_s24 = sshll.u32 %s378_s10, 3  ;;  %v110_v0 = vld [vmem:[#allocation2] sm:$0xff] }
  0x16   : > { %s193_s25 = sshll.u32 %s107_s23, 3  ;;  %s124_s28 = scalar_lea.hbm %s442_s1, %s195_s24  ;;  %v111_v1 = vadd.f32 1.0, %v110_v0 }
  0x17   : > { %s109_s29 = scalar_lea.vmem [#allocation5], %s193_s25  ;;  %s128_s2 = sshll.u32 %s124_s28, 4  ;;  %s129_s2 = int_to_ptr.hbm [resolvable:$true] %s128_s2 }
  0x18   : > { %s126_s30 = sshll.u32 %s109_s29, 4  ;;  %112 = vst [vmem:[%s109_s29] sm:$0xff] %v111_v1  ;;  %s114_s3 = scalar_lea.sflag [#allocation4], %s107_s23  ;;  %s127_s30 = int_to_ptr.vmem [resolvable:$true] %s126_s30 }
  0x19   : > { %s292_s4 = sshra.s32 %s129_s2, 4  ;;  %s298_s13 = scalar_lea.hbm %s442_s1, 16  ;;  %s293_s4 = int_to_ptr.hbm [resolvable:$true] %s292_s4 }
  0x1a   : > { %s294_s5 = scalar_lea.hbm %s293_s4, 8  ;;  %p299_p2 = scmp.lt.s32.totalorder %s293_s4, %s442_s1 }
  0x1b   : > { %p295_p13 = scmp.ne.s32.totalorder %s293_s4, %s294_s5  ;;  %p300_p3 = scmp.lt.s32.totalorder %s298_s13, %s294_s5 }
  0x1d   : > { %p296_p0 = pnand %p295_p13, %p395_p5  ;;  %p301_p4 = por %p300_p3, %p299_p2 }
  0x1f   : > { %p297_p1 = pneg %p296_p0 }
  0x21   : > { %p302_p7 = pnand %p301_p4, %p297_p1 }
  0x23   : > { %305 = shalt.err (!%p302_p7)
}
  0x24   : > { %202 = dma.vmem_to_hbm [thread:$0]  (%p395_p5), %s127_s30, 128, %s129_s2, %s114_s3  }
  0x25 PF: > { %p214_p8 = scmp.ge.s32.totalorder %s344_s9, 2  ;;  %s140_s19 = sand.u32 1, %s332_s6  }
  0x26   : > { %s141_s20 = scalar_lea.sflag [#allocation4], %s140_s19 }
  0x27   : > { %p209_p9 = pnand %p214_p8, %p399_p6 }
  0x29   : > { %p210_p10 = pneg %p209_p9 }
  0x2b   : > { %327 = dma.done.wait (%p210_p10), %s141_s20, 128  }
  0x2c   : > { %329 = vsyncadd (%p210_p10), %s141_s20, 4294967168  ;;  %p12_p11 = scmp.ge.s32.totalorder %s382_s12, 4   ;;  %s445_s6 = smov %s336_s7 }
  0x2d   : > { %s446_s7 = smov %s340_s8  ;;  %s447_s8 = smov %s393_s15 }
  0x2e   : > { %s448_s9 = smov %s382_s12  ;;  %14 = sbr.rel (!%p12_p11) target bundleno = 4 (0x4), region = 61 }
  0x33   :  { %147 = vsyncpa [#allocation3], 1 }
  0x34   :  { %149 = vsyncpa [#allocation3 + $0x1], 1 }
  0x35   :  { %150 = vsyncpa [#allocation4], 1 }
  0x36   :  { %152 = vsyncpa [#allocation4 + $0x1], 1 }

// kernel: _inverse_rotate_impl.1
= control target key start
LH: loop header
LB: loop body
LE: loop exit
PB: predicated region body
PF: predicated region fallthrough
CT: control target
= control target key end

     0   :  { %s270_s9 = smov 0   ;;  %s335_s0 = inlined_call_operand.vmem [shape: f32[16,128], index: 0, kind: input, shape index: {}]   ;;  %s336_s1 = inlined_call_operand.vmem [shape: f32[128,128], index: 1, kind: input, shape index: {}]   ;;  %s337_s2 = inlined_call_operand.vmem [shape: f32[16,128], index: 2, kind: output, shape index: {}]  }
   0x1 LB: > { %s230_s10 = sadd.s32 4294967295, %s253_s9   ;;  %p234_p0 = scmp.ge.s32.totalorder %s253_s9, 1  ;;  %s253_s9 = sphi %s270_s9, %s12_s9  }
   0x2   : > { %p111_p1 = scmp.lt.s32.totalorder %s253_s9, 3 }
   0x4   : > { %p112_p2 = pnand %p234_p0, %p111_p1 }
   0x5   : > { %p131_p3 = scmp.lt.s32.totalorder (!%p112_p2), %s230_s10, 1 }
   0x6   : > { %115 = sbr.rel (%p112_p2) target bundleno = 170 (0xaa), region = 28 }
   0xb   : > { %v155_v0 = vld [vmem:[%s336_s1 + $0x78] sm:$0xff]  ;;  %v154_v1 = vld [vmem:[%s336_s1 + $0x70] sm:$0xff]  ;;  %v153_v2 = vld [vmem:[%s336_s1 + $0x68] sm:$0xff]  ;;  %s339_s10 = smov (!%p131_p3, %s230_s10), 1 }
   0xc   : > { %156 = vmatpush.msra.mxu0 %v155_v0  ;;  %v152_v3 = vld [vmem:[%s336_s1 + $0x60] sm:$0xff]  ;;  %v151_v4 = vld [vmem:[%s336_s1 + $0x58] sm:$0xff]  ;;  %v150_v5 = vld [vmem:[%s336_s1 + $0x50] sm:$0xff]  ;;  %s235_s11 = sshll.u32 %s339_s10, 3 }
   0xd   : > { %v149_v6 = vld [vmem:[%s336_s1 + $0x48] sm:$0xff]  ;;  %v148_v7 = vld [vmem:[%s336_s1 + $0x40] sm:$0xff]  ;;  %v147_v8 = vld [vmem:[%s336_s1 + $0x38] sm:$0xff]  ;;  %s134_s18 = scalar_lea.vmem %s335_s0, %s235_s11  ;;  %s138_s22 = scalar_lea.vmem %s337_s2, %s235_s11 }
   0xe   : > { %157 = vmatpush.msra.mxu0 %v154_v1  ;;  %v146_v9 = vld [vmem:[%s336_s1 + $0x30] sm:$0xff]  ;;  %v145_v10 = vld [vmem:[%s336_s1 + $0x28] sm:$0xff]  ;;  %v144_v11 = vld [vmem:[%s336_s1 + $0x20] sm:$0xff] }
   0xf   : > { %v143_v12 = vld [vmem:[%s336_s1 + $0x18] sm:$0xff]  ;;  %v142_v13 = vld [vmem:[%s336_s1 + $0x10] sm:$0xff]  ;;  %v141_v14 = vld [vmem:[%s336_s1 + $0x8] sm:$0xff] }
  0x10   : > { %158 = vmatpush.msra.mxu0 %v153_v2  ;;  %v140_v15 = vld [vmem:[%s336_s1] sm:$0xff] }
  0x11   : > { %v139_v16 = vld [vmem:[%s134_s18] sm:$0xff] }
  0x12   : > { %159 = vmatpush.msra.mxu0 %v152_v3 }
  0x14   : > { %160 = vmatpush.msra.mxu0 %v151_v4 }
  0x16   : > { %161 = vmatpush.msra.mxu0 %v150_v5 }
  0x18   : > { %162 = vmatpush.msra.mxu0 %v149_v6 }
  0x1a   : > { %163 = vmatpush.msra.mxu0 %v148_v7 }
  0x1c   : > { %164 = vmatpush.msra.mxu0 %v147_v8 }
  0x1e   : > { %165 = vmatpush.msra.mxu0 %v146_v9 }
  0x20   : > { %166 = vmatpush.msra.mxu0 %v145_v10 }
  0x22   : > { %167 = vmatpush.msra.mxu0 %v144_v11 }
  0x24   : > { %168 = vmatpush.msra.mxu0 %v143_v12 }
  0x26   : > { %169 = vmatpush.msra.mxu0 %v142_v13 }
  0x28   : > { %170 = vmatpush.msra.mxu0 %v141_v14 }
  0x2a   : > { %171 = vmatpush.msra.mxu0 %v140_v15 }
  0x2b   : > { %172 = vmatmul.f32.vlgmr.msra.gmra.mxu0 %v139_v16 }
  0xa8   : > { %v173_v17 = vpop.f32.mrf.mxu0 }
  0xa9   : > { %176 = vst [vmem:[%s138_s22] sm:$0xff] %v173_v17 }
  0xaa PF: > { %s12_s9 = sadd.s32 1, %s253_s9  }
  0xab   : > { %p9_p4 = scmp.ge.s32.totalorder %s12_s9, 4  }
  0xad   :  { %11 = sbr.rel (!%p9_p4) target bundleno = 1 (0x1), region = 58 }

</bundles_post_ra>
